<compile_context>
chip_gen: v7x
topology: tpu7x:2x2x1
jax: 0.10.0
libtpu: 0.0.40
codegen_flags: <defaults>
</compile_context>

<pallas_src>
import functools

import jax
import jax.numpy as jnp
import numpy as np
from jax.experimental import pallas as pl
from jax.experimental.pallas import tpu as pltpu

_LANE = 128            # vreg / MXU lane width
_ROW_ALIGN = 16        # bf16 min second-minor tile
_MAX_TILE_M = 1024     # unreduced-path M tile (mem-bound: big DMAs, few steps)
_MAX_TILE_T = 512      # reduced-path T tile
_BLOCK_B = 8           # reduced-path batch rows per grid step (full sublanes)


def _round_up(x, m):
    return (x + m - 1) // m * m


def _cdiv(a, b):
    return -(-a // b)


def _balanced_tiles(total, max_tile, align, min_tiles=1):
    """Split `total` into >= min_tiles near-equal, `align`-aligned tiles of
    size <= max_tile (minimizes zero padding of the last tile)."""
    n = max(min_tiles, _cdiv(total, max_tile))
    tile = _round_up(_cdiv(total, n), align)
    n = _cdiv(total, tile)
    return tile, n


def _vmem_limit_bytes():
    try:
        cap = int(pltpu.get_tpu_info().vmem_capacity_bytes)
    except Exception:
        cap = 64 << 20
    if cap >= (128 << 20):      # v5e / v6e: 128 MiB physical
        return 64 << 20
    return min(48 << 20, cap)   # v7x: 64 MiB physical -> leave headroom


# ----------------------------------------------------------------------------
# Kernels
# ----------------------------------------------------------------------------
def _encode_tile(frames, w_enc_ref, b_enc_ref, w_proj_ref, b_proj_ref,
                 output_final_proj):
    """bf16 MXU operands, f32 accumulate; elementwise math in f32 (v5e VPU
    has no bf16)."""
    z = jnp.dot(frames, w_enc_ref[...], preferred_element_type=jnp.float32)
    z = jax.nn.gelu(z + b_enc_ref[...])
    if output_final_proj:
        z = jnp.dot(z.astype(w_proj_ref.dtype), w_proj_ref[...],
                    preferred_element_type=jnp.float32) + b_proj_ref[...]
    return z


def _gemm_kernel(*refs, output_final_proj):
    """Fused encoder matmul + GELU (+ final_proj) on one [TILE_M, W] tile."""
    if output_final_proj:
        frames_ref, w_enc_ref, b_enc_ref, w_proj_ref, b_proj_ref, out_ref = refs
    else:
        frames_ref, w_enc_ref, b_enc_ref, out_ref = refs
        w_proj_ref = b_proj_ref = None
    out_ref[...] = _encode_tile(frames_ref[...], w_enc_ref, b_enc_ref,
                                w_proj_ref, b_proj_ref, output_final_proj)


def _reduced_kernel(*refs, mean, output_final_proj, seq_len, tile_t, block_b):
    """GEMM on an (8 batch x tile_t) block + running sum/max over the T axis."""
    if output_final_proj:
        frames_ref, w_enc_ref, b_enc_ref, w_proj_ref, b_proj_ref, out_ref = refs
    else:
        frames_ref, w_enc_ref, b_enc_ref, out_ref = refs
        w_proj_ref = b_proj_ref = None
    t = pl.program_id(1)

    @pl.when(t == 0)
    def _init():
        if mean:
            out_ref[...] = jnp.zeros_like(out_ref)
        else:
            out_ref[...] = jnp.full_like(out_ref, -jnp.inf)

    w = frames_ref.shape[-1]
    frames = frames_ref[...].reshape(block_b * tile_t, w)
    z = _encode_tile(frames, w_enc_ref, b_enc_ref, w_proj_ref, b_proj_ref,
                     output_final_proj)                  # [block_b*tile_t, Np] f32
    n = z.shape[-1]

    if mean:
        # Per-batch masked time-sum as one [block_b, block_b*tile_t] x
        # [block_b*tile_t, Np] MXU matmul; the block-diagonal 0/1 mask also
        # zeroes the zero-padded tail rows of the last T tile.
        r = jax.lax.broadcasted_iota(jnp.int32, (block_b, block_b * tile_t), 1)
        i = jax.lax.broadcasted_iota(jnp.int32, (block_b, block_b * tile_t), 0)
        lo = i * tile_t
        valid = (r >= lo) & (r < lo + tile_t) & ((r - lo + t * tile_t) < seq_len)
        out_ref[...] += jnp.dot(valid.astype(jnp.float32), z,
                                preferred_element_type=jnp.float32)

        @pl.when(t == pl.num_programs(1) - 1)
        def _finalize():
            out_ref[...] = out_ref[...] * (1.0 / seq_len)
    else:
        z3 = z.reshape(block_b, tile_t, n)
        row = jax.lax.broadcasted_iota(jnp.int32, (1, tile_t, 1), 1)
        zm = jnp.where((t * tile_t + row) < seq_len, z3, -jnp.inf)
        out_ref[...] = jnp.maximum(out_ref[...], jnp.max(zm, axis=1))


# ----------------------------------------------------------------------------
# Module wrapper
# ----------------------------------------------------------------------------
class BackbonePallas:
    """Pallas equivalent of Backbone(pretrained_model, type='w2v', ...)."""

    def __init__(self, params, frame_w, mean=False, pooling=False,
                 output_final_proj=False):
        if pooling:
            assert mean is False, 'If pooling, no average should be done.'
        self.params = params
        self.frame_w = frame_w
        self._mean = mean
        self.pooling = pooling
        self.output_final_proj = output_final_proj
        self.type = 'w2v'
        self.frozen = False

    @property
    def mean(self):
        return self._mean

    @property
    def dim(self):
        w_enc, _, w_proj, _ = self.params
        return w_proj.shape[1] if self.output_final_proj else w_enc.shape[1]

    def _prepared_params(self):
        w_enc, b_enc, w_proj, b_proj = self.params
        W, D = w_enc.shape
        F = w_proj.shape[1]
        Dp, Fp = _round_up(D, _LANE), _round_up(F, _LANE)
        # Only the lane (output-feature) dims are padded to 128; the frame
        # width W (contraction dim) stays unpadded so frame HBM traffic is not
        # inflated. Matmul operands in bf16, biases in f32.
        w_enc_p = jnp.pad(w_enc, ((0, 0), (0, Dp - D))).astype(jnp.bfloat16)
        b_enc_p = jnp.pad(b_enc.astype(jnp.float32).reshape(1, D),
                          ((0, 0), (0, Dp - D)))
        w_proj_p = jnp.pad(w_proj, ((0, Dp - D), (0, Fp - F))).astype(jnp.bfloat16)
        b_proj_p = jnp.pad(b_proj.astype(jnp.float32).reshape(1, F),
                           ((0, 0), (0, Fp - F)))
        return (w_enc_p, b_enc_p, w_proj_p, b_proj_p), (W, D, F, Dp, Fp)

    def __call__(self, x, padding_mask=None):
        if padding_mask is not None:
            # TODO(synk): variable-length masking (per-batch length via scalar
            # prefetch into SMEM) not implemented in this synthetic kernel.
            raise RuntimeError('padding_mask not supported in this synthetic kernel')

        (w_enc_p, b_enc_p, w_proj_p, b_proj_p), dims = self._prepared_params()
        W, D, F, Dp, Fp = dims
        B, L = x.shape
        T = L // self.frame_w
        assert T >= 1, 'waveform shorter than one frame'

        outdim = F if self.output_final_proj else D
        Np = Fp if self.output_final_proj else Dp
        vmem_limit = _vmem_limit_bytes()

        weight_specs = [
            pl.BlockSpec((W, Dp), lambda *_: (0, 0)),    # encoder weight (bf16)
            pl.BlockSpec((1, Dp), lambda *_: (0, 0)),    # encoder bias   (f32)
        ]
        weight_args = [w_enc_p, b_enc_p]
        weight_bytes = 2 * W * Dp + 4 * Dp
        proj_flops = 0
        if self.output_final_proj:
            weight_specs += [pl.BlockSpec((Dp, Fp), lambda *_: (0, 0)),
                             pl.BlockSpec((1, Fp), lambda *_: (0, 0))]
            weight_args += [w_proj_p, b_proj_p]
            weight_bytes += 2 * Dp * Fp + 4 * Fp
            proj_flops = 2 * Dp * Fp

        if self._mean or self.pooling:
            # ---- reduced path: grid (B blocks of 8, T tiles); full-sublane
            # (8, Np) per-block output accumulator resident over T. ----
            B_pad = _round_up(B, _BLOCK_B)
            nb = B_pad // _BLOCK_B
            tile_t, nt = _balanced_tiles(T, _MAX_TILE_T, _ROW_ALIGN)
            t_pad = nt * tile_t
            frames = x[:, :T * self.frame_w].reshape(B, T, self.frame_w)
            frames = frames.astype(jnp.bfloat16)
            if (B_pad, t_pad) != (B, T):
                frames = jnp.pad(frames, ((0, B_pad - B), (0, t_pad - T), (0, 0)))

            kernel = functools.partial(
                _reduced_kernel, mean=self._mean,
                output_final_proj=self.output_final_proj,
                seq_len=T, tile_t=tile_t, block_b=_BLOCK_B)

            rows = B_pad * t_pad
            red_flops = 2 * _BLOCK_B * Np if self._mean else 2 * Np
            cost = pl.CostEstimate(
                flops=int(rows * (2 * W * Dp + proj_flops + red_flops)),
                transcendentals=int(rows * Dp),
                bytes_accessed=int(2 * rows * W + weight_bytes + 4 * B_pad * Np))

            out = pl.pallas_call(
                kernel,
                grid=(nb, nt),
                in_specs=[pl.BlockSpec((_BLOCK_B, tile_t, W),
                                       lambda b, t: (b, t, 0))] + weight_specs,
                out_specs=pl.BlockSpec((_BLOCK_B, Np), lambda b, t: (b, 0)),
                out_shape=jax.ShapeDtypeStruct((B_pad, Np), jnp.float32),
                compiler_params=pltpu.CompilerParams(
                    dimension_semantics=("parallel", "arbitrary"),
                    vmem_limit_bytes=vmem_limit),
                cost_estimate=cost,
            )(frames, *weight_args)
            if B_pad == B and Np == outdim:
                return out
            return out[:B, :outdim]

        # ---- unreduced path: collapse B*T into one MXU-friendly M axis. ----
        M = B * T
        # Keep >=2 M tiles (when M is big enough) so the parallel axis can
        # shard across v7x's two TensorCores; harmless on v5e/v6e.
        min_m_tiles = 2 if M > _ROW_ALIGN else 1
        tile_m, nm = _balanced_tiles(M, _MAX_TILE_M, _ROW_ALIGN, min_m_tiles)
        m_pad = nm * tile_m
        frames_flat = x[:, :T * self.frame_w].reshape(M, self.frame_w)
        frames_flat = frames_flat.astype(jnp.bfloat16)
        if m_pad != M:
            frames_flat = jnp.pad(frames_flat, ((0, m_pad - M), (0, 0)))

        kernel = functools.partial(
            _gemm_kernel, output_final_proj=self.output_final_proj)

        cost = pl.CostEstimate(
            flops=int(m_pad * (2 * W * Dp + proj_flops)),
            transcendentals=int(m_pad * Dp),
            bytes_accessed=int(2 * m_pad * W + weight_bytes + 4 * m_pad * Np))

        out = pl.pallas_call(
            kernel,
            grid=(nm,),
            in_specs=[pl.BlockSpec((tile_m, W), lambda m: (m, 0))] + weight_specs,
            out_specs=pl.BlockSpec((tile_m, Np), lambda m: (m, 0)),
            out_shape=jax.ShapeDtypeStruct((m_pad, Np), jnp.float32),
            compiler_params=pltpu.CompilerParams(
                dimension_semantics=("parallel",),
                vmem_limit_bytes=vmem_limit),
            cost_estimate=cost,
        )(frames_flat, *weight_args)
        # At real wav2vec2 dims (D/F multiples of 128, M multiple of the tile)
        # no slice pass is needed; only slice when padding actually occurred.
        if m_pad == M and Np == outdim:
            return out.reshape(B, T, outdim)
        return out[:M, :outdim].reshape(B, T, outdim)


# ----------------------------------------------------------------------------
# Pure-JAX reference with identical semantics (same bf16 operand casting)
# ----------------------------------------------------------------------------
def _reference(x, params, frame_w, mean=False, pooling=False,
               output_final_proj=False):
    w_enc, b_enc, w_proj, b_proj = params
    B, L = x.shape
    T = L // frame_w
    frames = x[:, :T * frame_w].reshape(B, T, frame_w).astype(jnp.bfloat16)
    z = jnp.einsum('btw,wd->btd', frames, w_enc.astype(jnp.bfloat16),
                   preferred_element_type=jnp.float32)
    z = jax.nn.gelu(z + b_enc.astype(jnp.float32))
    if output_final_proj:
        z = jnp.einsum('btd,df->btf', z.astype(jnp.bfloat16),
                       w_proj.astype(jnp.bfloat16),
                       preferred_element_type=jnp.float32)
        z = z + b_proj.astype(jnp.float32)
    if mean:
        return jnp.mean(z, axis=1)
    if pooling:
        return jnp.max(z, axis=1)
    return z


if __name__ == "__main__":
    # Small shapes consistent with the module's forward:
    # B=2 utterances, L=256 raw samples, frame width W=32 -> T=8 frames,
    # hidden D=32, final_dim F=16.
    B, L, W, D, F = 2, 256, 32, 32, 16

    key = jax.random.PRNGKey(0)
    kx, k1, k2, k3, k4 = jax.random.split(key, 5)
    x = jax.random.normal(kx, (B, L), dtype=jnp.float32)
    params = (
        0.1 * jax.random.normal(k1, (W, D), dtype=jnp.float32),   # encoder weight
        0.1 * jax.random.normal(k2, (1, D), dtype=jnp.float32),   # encoder bias
        0.1 * jax.random.normal(k3, (D, F), dtype=jnp.float32),   # final_proj weight
        0.1 * jax.random.normal(k4, (1, F), dtype=jnp.float32),   # final_proj bias
    )

    configs = [
        dict(mean=True,  pooling=False, output_final_proj=True),   # mean over time
        dict(mean=False, pooling=True,  output_final_proj=True),   # max-pool over time
        dict(mean=True,  pooling=False, output_final_proj=False),  # mean, no proj
        dict(mean=False, pooling=False, output_final_proj=False),  # raw hidden states
        dict(mean=False, pooling=False, output_final_proj=True),   # raw projected states
    ]

    for cfg in configs:
        model = BackbonePallas(params, frame_w=W, **cfg)
        out = jax.block_until_ready(model(x))
        ref = _reference(x, params, W, **cfg)
        np.testing.assert_allclose(np.asarray(out), np.asarray(ref),
                                   rtol=2e-3, atol=2e-3)

    print("KERNEL_OK")
</pallas_src>

<mosaic_0001>
module attributes {stable_mosaic.version = 11 : i64} {
  func.func @_reduced_kernel(%arg0: i32, %arg1: i32, %arg2: memref<8x16x32xbf16, #tpu.memory_space<vmem>>, %arg3: memref<32x128xbf16, #tpu.memory_space<vmem>>, %arg4: memref<1x128xf32, #tpu.memory_space<vmem>>, %arg5: memref<128x128xbf16, #tpu.memory_space<vmem>>, %arg6: memref<1x128xf32, #tpu.memory_space<vmem>>, %arg7: memref<8x128xf32, #tpu.memory_space<vmem>>) attributes {dimension_semantics = [#tpu.dimension_semantics<parallel>, #tpu.dimension_semantics<arbitrary>], iteration_bounds = array<i64: 1, 1>, scalar_prefetch = 0 : i64, scratch_operands = 0 : i64, tpu.core_type = #tpu.core_type<tc>, window_params = [{transform_indices = @transform_0, window_bounds = array<i64: 8, 16, 32>}, {pipeline_mode = #tpu.pipeline_mode<synchronous>, transform_indices = @transform_1, window_bounds = array<i64: 32, 128>}, {pipeline_mode = #tpu.pipeline_mode<synchronous>, transform_indices = @transform_2, window_bounds = array<i64: 1, 128>}, {pipeline_mode = #tpu.pipeline_mode<synchronous>, transform_indices = @transform_3, window_bounds = array<i64: 128, 128>}, {pipeline_mode = #tpu.pipeline_mode<synchronous>, transform_indices = @transform_4, window_bounds = array<i64: 1, 128>}, {transform_indices = @transform_5, window_bounds = array<i64: 8, 128>}]} {
    %c0_i32 = arith.constant 0 : i32
    %0 = arith.cmpi eq, %arg1, %c0_i32 : i32
    %1 = arith.extui %0 : i1 to i32
    %c0_i32_0 = arith.constant 0 : i32
    %2 = arith.cmpi ne, %1, %c0_i32_0 : i32
    scf.if %2 {
      %cst_25 = arith.constant 0.000000e+00 : f32
      %54 = vector.broadcast %cst_25 : f32 to vector<8x128xf32>
      %c0_26 = arith.constant 0 : index
      %c0_27 = arith.constant 0 : index
      %55 = vector.load %arg7[%c0_26, %c0_27] : memref<8x128xf32, #tpu.memory_space<vmem>>, vector<8x128xf32>
      tpu.vector_store %arg7[%c0_26, %c0_27], %54 {strides = array<i32>} : memref<8x128xf32, #tpu.memory_space<vmem>>, vector<8x128xf32>,
    } else {
    }
    %c0 = arith.constant 0 : index
    %c0_1 = arith.constant 0 : index
    %c0_2 = arith.constant 0 : index
    %3 = vector.load %arg2[%c0, %c0_1, %c0_2] : memref<8x16x32xbf16, #tpu.memory_space<vmem>>, vector<8x16x32xbf16>
    %4 = vector.shape_cast %3 : vector<8x16x32xbf16> to vector<128x32xbf16>
    %c0_3 = arith.constant 0 : index
    %c0_4 = arith.constant 0 : index
    %5 = vector.load %arg3[%c0_3, %c0_4] : memref<32x128xbf16, #tpu.memory_space<vmem>>, vector<32x128xbf16>
    %cst = arith.constant dense<0.000000e+00> : vector<128x128xf32>
    %6 = tpu.matmul %4, %5, %cst {dimension_numbers = #tpu.dot_dimension_numbers<[1], [0], [0], [1], [0, 0, 1, 1], [], []>} : vector<128x32xbf16>, vector<32x128xbf16>, vector<128x128xf32> -> vector<128x128xf32>
    %c0_5 = arith.constant 0 : index
    %c0_6 = arith.constant 0 : index
    %7 = vector.load %arg4[%c0_5, %c0_6] : memref<1x128xf32, #tpu.memory_space<vmem>>, vector<1x128xf32>
    %8 = vector.broadcast %7 : vector<1x128xf32> to vector<128x128xf32>
    %9 = arith.addf %6, %8 : vector<128x128xf32>
    %10 = arith.mulf %9, %9 : vector<128x128xf32>
    %11 = arith.mulf %9, %10 : vector<128x128xf32>
    %cst_7 = arith.constant 4.471500e-02 : f32
    %12 = vector.broadcast %cst_7 : f32 to vector<128x128xf32>
    %13 = arith.mulf %12, %11 : vector<128x128xf32>
    %14 = arith.addf %9, %13 : vector<128x128xf32>
    %cst_8 = arith.constant 0.797884583 : f32
    %15 = vector.broadcast %cst_8 : f32 to vector<128x128xf32>
    %16 = arith.mulf %15, %14 : vector<128x128xf32>
    %17 = math.tanh %16 : vector<128x128xf32>
    %cst_9 = arith.constant 1.000000e+00 : f32
    %18 = vector.broadcast %cst_9 : f32 to vector<128x128xf32>
    %19 = arith.addf %18, %17 : vector<128x128xf32>
    %cst_10 = arith.constant 5.000000e-01 : f32
    %20 = vector.broadcast %cst_10 : f32 to vector<128x128xf32>
    %21 = arith.mulf %20, %19 : vector<128x128xf32>
    %22 = arith.mulf %9, %21 : vector<128x128xf32>
    %23 = arith.truncf %22 : vector<128x128xf32> to vector<128x128xbf16>
    %c0_11 = arith.constant 0 : index
    %c0_12 = arith.constant 0 : index
    %24 = vector.load %arg5[%c0_11, %c0_12] : memref<128x128xbf16, #tpu.memory_space<vmem>>, vector<128x128xbf16>
    %cst_13 = arith.constant dense<0.000000e+00> : vector<128x128xf32>
    %25 = tpu.matmul %23, %24, %cst_13 {dimension_numbers = #tpu.dot_dimension_numbers<[1], [0], [0], [1], [0, 0, 1, 1], [], []>} : vector<128x128xbf16>, vector<128x128xbf16>, vector<128x128xf32> -> vector<128x128xf32>
    %c0_14 = arith.constant 0 : index
    %c0_15 = arith.constant 0 : index
    %26 = vector.load %arg6[%c0_14, %c0_15] : memref<1x128xf32, #tpu.memory_space<vmem>>, vector<1x128xf32>
    %27 = vector.broadcast %26 : vector<1x128xf32> to vector<128x128xf32>
    %28 = arith.addf %25, %27 : vector<128x128xf32>
    %29 = tpu.iota {dimensions = array<i32: 1>} : vector<8x128xi32>
    %30 = tpu.iota {dimensions = array<i32: 0>} : vector<8x128xi32>
    %c16_i32 = arith.constant 16 : i32
    %31 = vector.broadcast %c16_i32 : i32 to vector<8x128xi32>
    %32 = arith.muli %30, %31 : vector<8x128xi32>
    %33 = arith.cmpi sge, %29, %32 : vector<8x128xi32>
    %c16_i32_16 = arith.constant 16 : i32
    %34 = vector.broadcast %c16_i32_16 : i32 to vector<8x128xi32>
    %35 = arith.addi %32, %34 : vector<8x128xi32>
    %36 = arith.cmpi slt, %29, %35 : vector<8x128xi32>
    %37 = arith.andi %33, %36 : vector<8x128xi1>
    %38 = arith.subi %29, %32 : vector<8x128xi32>
    %c16_i32_17 = arith.constant 16 : i32
    %39 = arith.muli %arg1, %c16_i32_17 : i32
    %40 = vector.broadcast %39 : i32 to vector<8x128xi32>
    %41 = arith.addi %38, %40 : vector<8x128xi32>
    %c8_i32 = arith.constant 8 : i32
    %42 = vector.broadcast %c8_i32 : i32 to vector<8x128xi32>
    %43 = arith.cmpi slt, %41, %42 : vector<8x128xi32>
    %44 = arith.andi %37, %43 : vector<8x128xi1>
    %c0_18 = arith.constant 0 : index
    %c0_19 = arith.constant 0 : index
    %45 = vector.load %arg7[%c0_18, %c0_19] : memref<8x128xf32, #tpu.memory_space<vmem>>, vector<8x128xf32>
    %46 = arith.extui %44 : vector<8x128xi1> to vector<8x128xi32>
    %47 = arith.sitofp %46 : vector<8x128xi32> to vector<8x128xf32>
    %cst_20 = arith.constant dense<0.000000e+00> : vector<8x128xf32>
    %48 = tpu.matmul %47, %28, %cst_20 {dimension_numbers = #tpu.dot_dimension_numbers<[1], [0], [0], [1], [0, 0, 1, 1], [], []>} : vector<8x128xf32>, vector<128x128xf32>, vector<8x128xf32> -> vector<8x128xf32>
    %49 = arith.addf %45, %48 : vector<8x128xf32>
    %c0_21 = arith.constant 0 : index
    %c0_22 = arith.constant 0 : index
    %50 = vector.load %arg7[%c0_21, %c0_22] : memref<8x128xf32, #tpu.memory_space<vmem>>, vector<8x128xf32>
    tpu.vector_store %arg7[%c0_21, %c0_22], %49 {strides = array<i32>} : memref<8x128xf32, #tpu.memory_space<vmem>>, vector<8x128xf32>,
    %c0_i32_23 = arith.constant 0 : i32
    %51 = arith.cmpi eq, %arg1, %c0_i32_23 : i32
    %52 = arith.extui %51 : i1 to i32
    %c0_i32_24 = arith.constant 0 : i32
    %53 = arith.cmpi ne, %52, %c0_i32_24 : i32
    scf.if %53 {
      %c0_25 = arith.constant 0 : index
      %c0_26 = arith.constant 0 : index
      %54 = vector.load %arg7[%c0_25, %c0_26] : memref<8x128xf32, #tpu.memory_space<vmem>>, vector<8x128xf32>
      %cst_27 = arith.constant 1.250000e-01 : f32
      %55 = vector.broadcast %cst_27 : f32 to vector<8x128xf32>
      %56 = arith.mulf %54, %55 : vector<8x128xf32>
      %c0_28 = arith.constant 0 : index
      %c0_29 = arith.constant 0 : index
      %57 = vector.load %arg7[%c0_28, %c0_29] : memref<8x128xf32, #tpu.memory_space<vmem>>, vector<8x128xf32>
      tpu.vector_store %arg7[%c0_28, %c0_29], %56 {strides = array<i32>} : memref<8x128xf32, #tpu.memory_space<vmem>>, vector<8x128xf32>,
    } else {
    }
    return
  }
  func.func @transform_0(%arg0: i32, %arg1: i32) -> (i32, i32, i32) {
    %c0_i32 = arith.constant 0 : i32
    %c0_i32_0 = arith.constant 0 : i32
    return %arg0, %arg1, %c0_i32 : i32, i32, i32
  }
  func.func @transform_1(%arg0: i32, %arg1: i32) -> (i32, i32) {
    %c0_i32 = arith.constant 0 : i32
    %c0_i32_0 = arith.constant 0 : i32
    %c0_i32_1 = arith.constant 0 : i32
    return %c0_i32, %c0_i32_0 : i32, i32
  }
  func.func @transform_2(%arg0: i32, %arg1: i32) -> (i32, i32) {
    %c0_i32 = arith.constant 0 : i32
    %c0_i32_0 = arith.constant 0 : i32
    %c0_i32_1 = arith.constant 0 : i32
    return %c0_i32, %c0_i32_0 : i32, i32
  }
  func.func @transform_3(%arg0: i32, %arg1: i32) -> (i32, i32) {
    %c0_i32 = arith.constant 0 : i32
    %c0_i32_0 = arith.constant 0 : i32
    %c0_i32_1 = arith.constant 0 : i32
    return %c0_i32, %c0_i32_0 : i32, i32
  }
  func.func @transform_4(%arg0: i32, %arg1: i32) -> (i32, i32) {
    %c0_i32 = arith.constant 0 : i32
    %c0_i32_0 = arith.constant 0 : i32
    %c0_i32_1 = arith.constant 0 : i32
    return %c0_i32, %c0_i32_0 : i32, i32
  }
  func.func @transform_5(%arg0: i32, %arg1: i32) -> (i32, i32) {
    %c0_i32 = arith.constant 0 : i32
    %c0_i32_0 = arith.constant 0 : i32
    return %arg0, %c0_i32 : i32, i32
  }
}

</mosaic_0001>

<bundles_post_ra>
// kernel: tpu_custom_call.1
= control target key start
LH: loop header
LB: loop body
LE: loop exit
PB: predicated region body
PF: predicated region fallthrough
CT: control target
= control target key end

     0   :  { %10 = vsyncpa [#allocation3], 0  ;;  %s1295_s0 = inlined_call_operand.hbm [shape: bf16[8,16,32], index: 0, kind: input, shape index: {}]   ;;  %s1296_s1 = inlined_call_operand.hbm [shape: bf16[32,128], index: 1, kind: input, shape index: {}]   ;;  %s1297_s2 = inlined_call_operand.vmem [shape: f32[1,128], index: 2, kind: input, shape index: {}]   ;;  %s1298_s3 = inlined_call_operand.hbm [shape: bf16[128,128], index: 3, kind: input, shape index: {}]   ;;  %s1299_s4 = inlined_call_operand.vmem [shape: f32[1,128], index: 4, kind: input, shape index: {}]   ;;  %s1300_s5 = inlined_call_operand.hbm [shape: f32[8,128], index: 5, kind: output, shape index: {}]  }
   0x1   :  { %11 = vsyncpa [#allocation6], 0 }
   0x2   :  { %12 = vsyncpa [#allocation4], 0  ;;  %s1039_s18 = smov [#allocation5]   ;;  %s1040_s20 = smov [#allocation2]  }
   0x3   :  { %s30_s19 = sshll.u32 %s1039_s18, 4  ;;  %s18_s21 = sshll.u32 %s1040_s20, 4  ;;  %s31_s19 = int_to_ptr.vmem [resolvable:$true] %s30_s19  ;;  %s1079_s21 = int_to_ptr.vmem [resolvable:$true] %s18_s21 }
   0x4   :  { %s945_s24 = scalar_lea.hbm %s1296_s1, 256 }
   0x5   :  { %p946_p0 = scmp.ne.s32.totalorder %s1296_s1, %s945_s24  ;;  %p949_p1 = scmp.lt.u32.totalorder %s945_s24, %s1296_s1 }
   0x7   :  { %p951_p2 = pnand %p949_p1, %p946_p0 }
   0x9   :  { %954 = shalt.err (!%p951_p2)
}
   0xa   :  { %s955_s29 = scalar_lea.vmem %s31_s19, 256  ;;  %p960_p4 = scmp.lt.s32.totalorder %s31_s19, %s31_s19 }
   0xb   :  { %p956_p3 = scmp.ne.s32.totalorder %s31_s19, %s955_s29  ;;  %p961_p5 = scmp.lt.s32.totalorder %s955_s29, %s955_s29 }
   0xd   :  { %p962_p6 = por %p961_p5, %p960_p4 }
   0xf   :  { %p963_p7 = pnand %p962_p6, %p956_p3 }
  0x11   :  { %966 = shalt.err (!%p963_p7)
}
  0x12   :  { %s1041_s30 = smov 64   ;;  %s1042_s6 = smov 4  }
  0x13   :  { %36 = dma.hbm_to_vmem [thread:$0]  %s1296_s1, 256, %s31_s19, [#allocation6], %s1041_s30, %s1041_s30, %s1042_s6  }
  0x14   :  { %s967_s11 = scalar_lea.hbm %s1295_s0, 1024 }
  0x15   :  { %p968_p8 = scmp.ne.s32.totalorder %s1295_s0, %s967_s11  ;;  %p971_p9 = scmp.lt.u32.totalorder %s967_s11, %s1295_s0 }
  0x17   :  { %p973_p10 = pnand %p971_p9, %p968_p8 }
  0x19   :  { %976 = shalt.err (!%p973_p10)
}
  0x1a   :  { %s977_s16 = scalar_lea.vmem %s1079_s21, 1024  ;;  %p982_p12 = scmp.lt.s32.totalorder %s1079_s21, %s1079_s21 }
  0x1b   :  { %p978_p11 = scmp.ne.s32.totalorder %s1079_s21, %s977_s16  ;;  %p983_p13 = scmp.lt.s32.totalorder %s977_s16, %s977_s16 }
  0x1d   :  { %p984_p0 = por %p983_p13, %p982_p12 }
  0x1f   :  { %p985_p1 = pnand %p984_p0, %p978_p11 }
  0x21   :  { %988 = shalt.err (!%p985_p1)
}
  0x22   :  { %24 = dma.hbm_to_vmem [thread:$0]  %s1295_s0, 1024, %s1079_s21, [#allocation3], %s1041_s30, %s1041_s30, %s1042_s6  }
  0x23   :  { %s1043_s18 = smov [#allocation7]   ;;  %s989_s23 = scalar_lea.hbm %s1298_s3, 1024 }
  0x24   :  { %s44_s19 = sshll.u32 %s1043_s18, 4  ;;  %p990_p2 = scmp.ne.s32.totalorder %s1298_s3, %s989_s23  ;;  %s45_s19 = int_to_ptr.vmem [resolvable:$true] %s44_s19 }
  0x25   :  { %p993_p3 = scmp.lt.u32.totalorder %s989_s23, %s1298_s3 }
  0x27   :  { %p995_p4 = pnand %p993_p3, %p990_p2 }
  0x29   :  { %998 = shalt.err (!%p995_p4)
}
  0x2a   :  { %s999_s28 = scalar_lea.vmem %s45_s19, 1024  ;;  %p1004_p6 = scmp.lt.s32.totalorder %s45_s19, %s45_s19 }
  0x2b   :  { %p1000_p5 = scmp.ne.s32.totalorder %s45_s19, %s999_s28  ;;  %p1005_p7 = scmp.lt.s32.totalorder %s999_s28, %s999_s28 }
  0x2d   :  { %p1006_p8 = por %p1005_p7, %p1004_p6 }
  0x2f   :  { %p1007_p9 = pnand %p1006_p8, %p1000_p5 }
  0x31   :  { %1010 = shalt.err (!%p1007_p9)
}
  0x32   :  { %50 = dma.hbm_to_vmem [thread:$0]  %s1298_s3, 1024, %s45_s19, [#allocation6], %s1041_s30, %s1041_s30, %s1042_s6  }
  0x33   :  { %1033 = dma.done.wait [#allocation3], 1024  }
  0x34   :  { %1034 = vsyncadd [#allocation3], 4294966272 }
  0x35   :  { %1035 = dma.done.wait [#allocation6], 1280  }
  0x36   :  { %1036 = vsyncadd [#allocation6], 4294966016  ;;  %v895_v0 = vld [vmem:[#allocation5] sm:$0xff]   ;;  %v896_v1 = vld [vmem:[#allocation5 + $0x8] sm:$0xff]   ;;  %vm147_vm0 = vcmask 261120   ;;  %vm1045_vm1 = vmmov 0  }
  0x37   :  { %774 = vmatprep.subr.bf16.mxu0 %v895_v0  ;;  %v897_v2 = vld [vmem:[#allocation2] sm:$0xff]   ;;  %v898_v3 = vld [vmem:[#allocation2 + $0x8] sm:$0xff]   ;;  %v899_v4 = vld [vmem:[#allocation2 + $0x10] sm:$0xff]  }
  0x38   :  { %775 = vmatpush3.bf16.msra.mxu0 %v895_v0  ;;  %778 = vmatprep.mubr.msk.bf16.mxu0 %vm147_vm0, %v897_v2  ;;  %v900_v5 = vld [vmem:[#allocation2 + $0x18] sm:$0xff]   ;;  %v901_v6 = vld [vmem:[#allocation2 + $0x20] sm:$0xff]   ;;  %v902_v7 = vld [vmem:[#allocation2 + $0x28] sm:$0xff]  }
  0x39   :  { %776 = vmatprep.subr.bf16.mxu0 %v896_v1  ;;  %v903_v8 = vld [vmem:[#allocation2 + $0x30] sm:$0xff]   ;;  %v904_v9 = vld [vmem:[#allocation2 + $0x38] sm:$0xff]   ;;  %v907_v12 = vld [vmem:[#allocation7 + $0x10] sm:$0xff]  }
  0x3a   :  { %v905_v10 = vld [vmem:[#allocation7] sm:$0xff]   ;;  %v906_v11 = vld [vmem:[#allocation7 + $0x8] sm:$0xff]   ;;  %v908_v13 = vld [vmem:[#allocation7 + $0x18] sm:$0xff]  }
  0x3b   :  { %794 = vmatprep.subr.bf16.mxu1 %v905_v10  ;;  %v909_v14 = vld [vmem:[#allocation7 + $0x20] sm:$0xff]   ;;  %v910_v15 = vld [vmem:[#allocation7 + $0x28] sm:$0xff]   ;;  %v911_v16 = vld [vmem:[#allocation7 + $0x30] sm:$0xff]  }
  0x3c   :  { %777 = vmatpush3.bf16.msra.mxu0 %v896_v1  ;;  %795 = vmatpush3.bf16.msra.mxu1 %v905_v10  ;;  %v912_v17 = vld [vmem:[#allocation7 + $0x38] sm:$0xff]   ;;  %v1142_v18 = vld [vmem:[%s1297_s2] ss:$0 sm:$0xff] }
  0x3d   :  { %796 = vmatprep.subr.bf16.mxu1 %v906_v11 }
  0x3f   :  { %779 = vmatmul.mubr.msk.bf16.vlgmr.msra.gmra.mrb[0].mxu0 %vm147_vm0, %v898_v3 }
  0x40   :  { %782 = vmatprep.mubr.msk.bf16.mxu0 %vm147_vm0, %v899_v4  ;;  %797 = vmatpush3.bf16.msra.mxu1 %v906_v11 }
  0x41   :  { %798 = vmatprep.subr.bf16.mxu1 %v907_v12 }
  0x44   :  { %799 = vmatpush3.bf16.msra.mxu1 %v907_v12 }
  0x45   :  { %800 = vmatprep.subr.bf16.mxu1 %v908_v13 }
  0x47   :  { %783 = vmatmul.mubr.msk.bf16.gmra.mrb[4].mxu0 %vm147_vm0, %v900_v5 }
  0x48   :  { %786 = vmatprep.mubr.msk.bf16.mxu0 %vm147_vm0, %v901_v6  ;;  %801 = vmatpush3.bf16.msra.mxu1 %v908_v13 }
  0x49   :  { %802 = vmatprep.subr.bf16.mxu1 %v909_v14 }
  0x4c   :  { %803 = vmatpush3.bf16.msra.mxu1 %v909_v14 }
  0x4d   :  { %804 = vmatprep.subr.bf16.mxu1 %v910_v15 }
  0x4f   :  { %787 = vmatmul.mubr.msk.bf16.gmra.mrb[8].mxu0 %vm147_vm0, %v902_v7 }
  0x50   :  { %790 = vmatprep.mubr.msk.bf16.mxu0 %vm147_vm0, %v903_v8  ;;  %805 = vmatpush3.bf16.msra.mxu1 %v910_v15 }
  0x51   :  { %806 = vmatprep.subr.bf16.mxu1 %v911_v16 }
  0x54   :  { %807 = vmatpush3.bf16.msra.mxu1 %v911_v16 }
  0x55   :  { %808 = vmatprep.subr.bf16.mxu1 %v912_v17 }
  0x57   :  { %791 = vmatmul.mubr.msk.bf16.gmra.mrb[12].mxu0 %vm147_vm0, %v904_v9 }
  0x58   :  { %809 = vmatpush3.bf16.msra.mxu1 %v912_v17 }
 0x112   :  { %v780_v19 = vpop.f32.mrb[0].mxu0 }
 0x113   :  { %v1145_v20 = vadd.f32 %v780_v19, %v1142_v18  ;;  %v206_v21 = vpop.f32.mrb[1].mxu0 }
 0x114   :  { %v1148_v22 = vadd.f32 %v1142_v18, %v206_v21  ;;  %v781_v23 = vpop.f32.mrb[2].mxu0 }
 0x115   :  { %v271_v24 = vmul.f32 %v1145_v20, %v1145_v20  ;;  %v1153_v25 = vadd.f32 %v781_v23, %v1142_v18  ;;  %v209_v26 = vpop.f32.mrb[3].mxu0 }
 0x116   :  { %v269_v27 = vmul.f32 %v1148_v22, %v1148_v22  ;;  %v1158_v28 = vadd.f32 %v1142_v18, %v209_v26 }
 0x117   :  { %v287_v29 = vmul.f32 %v271_v24, %v1145_v20  ;;  %v272_v30 = vmul.f32 %v1153_v25, %v1153_v25 }
 0x118   :  { %v285_v31 = vmul.f32 %v269_v27, %v1148_v22  ;;  %v270_v32 = vmul.f32 %v1158_v28, %v1158_v28 }
 0x119   :  { %v303_v33 = vmul.f32 0.044715, %v287_v29  ;;  %v288_v34 = vmul.f32 %v272_v30, %v1153_v25 }
 0x11a   :  { %v301_v35 = vmul.f32 0.044715, %v285_v31  ;;  %v286_v36 = vmul.f32 %v270_v32, %v1158_v28  ;;  %v784_v37 = vpop.f32.mrb[4].mxu0 }
 0x11b   :  { %v319_v38 = vadd.f32 %v303_v33, %v1145_v20  ;;  %v304_v39 = vmul.f32 0.044715, %v288_v34  ;;  %v1170_v40 = vadd.f32 %v784_v37, %v1142_v18  ;;  %v222_v41 = vpop.f32.mrb[5].mxu0 }
 0x11c   :  { %v302_v42 = vmul.f32 0.044715, %v286_v36  ;;  %v1173_v43 = vadd.f32 %v1142_v18, %v222_v41  ;;  %v785_v44 = vpop.f32.mrb[6].mxu0  ;;  %v317_v45 = vadd.f32 %v301_v35, %v1148_v22 }
 0x11d   :  { %v335_v46 = vmul.f32 0.7978846, %v319_v38  ;;  %v320_v47 = vadd.f32 %v304_v39, %v1153_v25  ;;  %v275_v48 = vmul.f32 %v1170_v40, %v1170_v40  ;;  %v1180_v49 = vadd.f32 %v785_v44, %v1142_v18  ;;  %v225_v50 = vpop.f32.mrb[7].mxu0 }
 0x11e   :  { %v273_v51 = vmul.f32 %v1173_v43, %v1173_v43  ;;  %v1185_v52 = vadd.f32 %v1142_v18, %v225_v50  ;;  %v318_v53 = vadd.f32 %v302_v42, %v1158_v28  ;;  %v333_v54 = vmul.f32 0.7978846, %v317_v45 }
 0x11f   :  { %913 = vtanh.f32 %v335_v46  ;;  %v336_v55 = vmul.f32 0.7978846, %v320_v47  ;;  %v291_v56 = vmul.f32 %v275_v48, %v1170_v40  ;;  %v276_v57 = vmul.f32 %v1180_v49, %v1180_v49 }
 0x120   :  { %v289_v58 = vmul.f32 %v273_v51, %v1173_v43  ;;  %v274_v59 = vmul.f32 %v1185_v52, %v1185_v52  ;;  %v334_v60 = vmul.f32 0.7978846, %v318_v53  ;;  %915 = vtanh.f32 %v333_v54 }
 0x121   :  { %917 = vtanh.f32 %v336_v55  ;;  %v307_v61 = vmul.f32 0.044715, %v291_v56  ;;  %v292_v62 = vmul.f32 %v276_v57, %v1180_v49 }
 0x122   :  { %v305_v63 = vmul.f32 0.044715, %v289_v58  ;;  %v290_v0 = vmul.f32 %v274_v59, %v1185_v52  ;;  %v788_v1 = vpop.f32.mrb[8].mxu0  ;;  %919 = vtanh.f32 %v334_v60 }
 0x123   :  { %v323_v2 = vadd.f32 %v307_v61, %v1170_v40  ;;  %v308_v3 = vmul.f32 0.044715, %v292_v62  ;;  %v1198_v4 = vadd.f32 %v788_v1, %v1142_v18  ;;  %v238_v5 = vpop.f32.mrb[9].mxu0 }
 0x124   :  { %v321_v6 = vadd.f32 %v305_v63, %v1173_v43  ;;  %v306_v7 = vmul.f32 0.044715, %v290_v0  ;;  %v1202_v8 = vadd.f32 %v1142_v18, %v238_v5  ;;  %v789_v9 = vpop.f32.mrb[10].mxu0 }
 0x125   :  { %v339_v10 = vmul.f32 0.7978846, %v323_v2  ;;  %v324_v11 = vadd.f32 %v308_v3, %v1180_v49  ;;  %v279_v12 = vmul.f32 %v1198_v4, %v1198_v4  ;;  %v1208_v13 = vadd.f32 %v789_v9, %v1142_v18  ;;  %v241_v14 = vpop.f32.mrb[11].mxu0 }
 0x126   :  { %v337_v15 = vmul.f32 0.7978846, %v321_v6  ;;  %v322_v16 = vadd.f32 %v306_v7, %v1185_v52  ;;  %v277_v17 = vmul.f32 %v1202_v8, %v1202_v8  ;;  %v1214_v19 = vadd.f32 %v1142_v18, %v241_v14 }
 0x127   :  { %921 = vtanh.f32 %v339_v10  ;;  %v340_v21 = vmul.f32 0.7978846, %v324_v11  ;;  %v295_v23 = vmul.f32 %v279_v12, %v1198_v4  ;;  %v280_v24 = vmul.f32 %v1208_v13, %v1208_v13 }
 0x128   :  { %923 = vtanh.f32 %v337_v15  ;;  %v338_v26 = vmul.f32 0.7978846, %v322_v16  ;;  %v293_v27 = vmul.f32 %v277_v17, %v1202_v8  ;;  %v278_v29 = vmul.f32 %v1214_v19, %v1214_v19 }
 0x129   :  { %v914_v30 = vpop.eup %913  ;;  %925 = vtanh.f32 %v340_v21  ;;  %v311_v31 = vmul.f32 0.044715, %v295_v23  ;;  %v296_v32 = vmul.f32 %v280_v24, %v1208_v13 }
 0x12a   :  { %v916_v33 = vpop.eup %915  ;;  %927 = vtanh.f32 %v338_v26  ;;  %v309_v34 = vmul.f32 0.044715, %v293_v27  ;;  %v294_v35 = vmul.f32 %v278_v29, %v1214_v19  ;;  %v792_v36 = vpop.f32.mrb[12].mxu0  ;;  %v367_v37 = vadd.f32 1.0, %v914_v30 }
 0x12b   :  { %v918_v38 = vpop.eup %917  ;;  %v327_v39 = vadd.f32 %v311_v31, %v1198_v4  ;;  %v312_v41 = vmul.f32 0.044715, %v296_v32  ;;  %v1226_v42 = vadd.f32 %v792_v36, %v1142_v18  ;;  %v254_v44 = vpop.f32.mrb[13].mxu0  ;;  %v365_v45 = vadd.f32 1.0, %v916_v33 }
 0x12c   :  { %v325_v46 = vadd.f32 %v309_v34, %v1202_v8  ;;  %v310_v47 = vmul.f32 0.044715, %v294_v35  ;;  %v1230_v48 = vadd.f32 %v1142_v18, %v254_v44  ;;  %v793_v50 = vpop.f32.mrb[14].mxu0  ;;  %v368_v51 = vadd.f32 1.0, %v918_v38  ;;  %v920_v58 = vpop.eup %919 }
 0x12d   :  { %v343_v53 = vmul.f32 0.7978846, %v327_v39  ;;  %v328_v54 = vadd.f32 %v312_v41, %v1208_v13  ;;  %v283_v55 = vmul.f32 %v1226_v42, %v1226_v42  ;;  %v1236_v56 = vadd.f32 %v793_v50, %v1142_v18  ;;  %v257_v57 = vpop.f32.mrb[15].mxu0 }
 0x12e   :  { %v341_v59 = vmul.f32 0.7978846, %v325_v46  ;;  %v326_v60 = vadd.f32 %v310_v47, %v1214_v19  ;;  %v281_v61 = vmul.f32 %v1230_v48, %v1230_v48  ;;  %v1242_v62 = vadd.f32 %v1142_v18, %v257_v57 }
 0x12f   :  { %929 = vtanh.f32 %v343_v53  ;;  %v344_v63 = vmul.f32 0.7978846, %v328_v54  ;;  %v299_v0 = vmul.f32 %v283_v55, %v1226_v42  ;;  %v284_v1 = vmul.f32 %v1236_v56, %v1236_v56 }
 0x130   :  { %931 = vtanh.f32 %v341_v59  ;;  %v342_v2 = vmul.f32 0.7978846, %v326_v60  ;;  %v297_v3 = vmul.f32 %v281_v61, %v1230_v48  ;;  %v282_v5 = vmul.f32 %v1242_v62, %v1242_v62 }
 0x131   :  { %v922_v6 = vpop.eup %921  ;;  %933 = vtanh.f32 %v344_v63  ;;  %v315_v7 = vmul.f32 0.044715, %v299_v0  ;;  %v300_v18 = vmul.f32 %v284_v1, %v1236_v56  ;;  %v366_v9 = vadd.f32 1.0, %v920_v58 }
 0x132   :  { %v924_v10 = vpop.eup %923  ;;  %935 = vtanh.f32 %v342_v2  ;;  %v313_v11 = vmul.f32 0.044715, %v297_v3  ;;  %v298_v12 = vmul.f32 %v282_v5, %v1242_v62  ;;  %v381_v14 = vmul.f32 0.5, %v365_v45 }
 0x133   :  { %v926_v15 = vpop.eup %925  ;;  %v331_v16 = vadd.f32 %v315_v7, %v1226_v42  ;;  %v316_v17 = vmul.f32 0.044715, %v300_v18  ;;  %v382_v21 = vmul.f32 0.5, %v366_v9  ;;  %v383_v23 = vmul.f32 0.5, %v367_v37 }
 0x134   :  { %v928_v24 = vpop.eup %927  ;;  %v329_v26 = vadd.f32 %v313_v11, %v1230_v48  ;;  %v314_v27 = vmul.f32 0.044715, %v298_v12  ;;  %v397_v29 = vmul.f32 %v381_v14, %v1148_v22  ;;  %v384_v30 = vmul.f32 0.5, %v368_v51 }
 0x135   :  { %v347_v31 = vmul.f32 0.7978846, %v331_v16  ;;  %v332_v32 = vadd.f32 %v316_v17, %v1236_v56  ;;  %v398_v33 = vmul.f32 %v382_v21, %v1158_v28  ;;  %v399_v34 = vmul.f32 %v383_v23, %v1145_v20 }
 0x136   :  { %v345_v35 = vmul.f32 0.7978846, %v329_v26  ;;  %v330_v36 = vadd.f32 %v314_v27, %v1242_v62  ;;  %v400_v38 = vmul.f32 %v384_v30, %v1153_v25  ;;  %v369_v37 = vadd.f32 1.0, %v924_v10 }
 0x137   :  { %937 = vtanh.f32 %v347_v31  ;;  %v348_v39 = vmul.f32 0.7978846, %v332_v32  ;;  %v413_v41 = vpack.c.bf16 %v398_v33, %v397_v29  ;;  %v370_v44 = vadd.f32 1.0, %v928_v24 }
 0x138   :  { %939 = vtanh.f32 %v345_v35  ;;  %v346_v22 = vmul.f32 0.7978846, %v330_v36  ;;  %v414_v45 = vpack.c.bf16 %v400_v38, %v399_v34  ;;  %v385_v46 = vmul.f32 0.5, %v369_v37 }
 0x139   :  { %v930_v47 = vpop.eup %929  ;;  %941 = vtanh.f32 %v348_v39  ;;  %810 = vmatprep.mubr.bf16.mxu1 %v413_v41  ;;  %v386_v28 = vmul.f32 0.5, %v370_v44  ;;  %v371_v50 = vadd.f32 1.0, %v922_v6  ;;  %v372_v20 = vadd.f32 1.0, %v926_v15 }
 0x13a   :  { %v932_v51 = vpop.eup %931  ;;  %943 = vtanh.f32 %v346_v22  ;;  %811 = vmatmul.mubr.bf16.vlgmr.msra.gmra.mrb[0].mxu1 %v414_v45  ;;  %v401_v25 = vmul.f32 %v385_v46, %v1173_v43  ;;  %v375_v53 = vadd.f32 1.0, %v930_v47  ;;  %v1044_v32 = vmov 0.0|0.0  }
 0x13b   :  { %v934_v54 = vpop.eup %933  ;;  %v402_v55 = vmul.f32 %v386_v28, %v1185_v52  ;;  %v387_v57 = vmul.f32 0.5, %v371_v50  ;;  %v388_v58 = vmul.f32 0.5, %v372_v20  ;;  %v373_v59 = vadd.f32 1.0, %v932_v51  ;;  %861 = vmatprep.subr.bf16.mxu0 %v1044_v32 }
 0x13c   :  { %v936_v60 = vpop.eup %935  ;;  %v376_v61 = vadd.f32 1.0, %v934_v54  ;;  %v391_v63 = vmul.f32 0.5, %v375_v53  ;;  %v1046_v33 = vmov 0.0   ;;  %v589_v53 = vlaneseq }
 0x13d   :  { %v415_v0 = vpack.c.bf16 %v402_v55, %v401_v25  ;;  %v403_v1 = vmul.f32 %v387_v57, %v1170_v40  ;;  %v404_v2 = vmul.f32 %v388_v58, %v1180_v49  ;;  %v374_v3 = vadd.f32 1.0, %v936_v60  ;;  %858 = vmatprep.mubr.msk.f32.mxu0 %vm1045_vm1, %v1046_v33 }
 0x13e   :  { %v389_v5 = vmul.f32 0.5, %v373_v59  ;;  %v392_v6 = vmul.f32 0.5, %v376_v61  ;;  %v407_v18 = vmul.f32 %v391_v63, %v1198_v4  ;;  %v592_v58 = vshrl.u32 %v589_v53, 7 }
 0x13f   :  { %814 = vmatprep.mubr.bf16.mxu1 %v415_v0  ;;  %v416_v43 = vpack.c.bf16 %v404_v2, %v403_v1  ;;  %v390_v7 = vmul.f32 0.5, %v374_v3 }
 0x140   :  { %v408_v52 = vmul.f32 %v392_v6, %v1208_v13  ;;  %v405_v10 = vmul.f32 %v389_v5, %v1202_v8  ;;  %v593_v3 = vmul.u32 16, %v592_v58 }
 0x141   :  { %v938_v9 = vpop.eup %937  ;;  %v406_v11 = vmul.f32 %v390_v7, %v1214_v19 }
 0x142   :  { %v940_v12 = vpop.eup %939  ;;  %815 = vmatmul.mubr.bf16.gmra.mrb[4].mxu1 %v416_v43  ;;  %v418_v40 = vpack.c.bf16 %v408_v52, %v407_v18  ;;  %v379_v14 = vadd.f32 1.0, %v938_v9  ;;  %v590_v43 = vand.u32 127, %v589_v53  ;;  %v595_v18 = vadd.s32 16, %v593_v3 }
 0x143   :  { %v942_v49 = vpop.eup %941  ;;  %v417_v15 = vpack.c.bf16 %v406_v11, %v405_v10  ;;  %v377_v16 = vadd.f32 1.0, %v940_v12 }
 0x144   :  { %v944_v17 = vpop.eup %943  ;;  %v380_v21 = vadd.f32 1.0, %v942_v49  ;;  %v395_v23 = vmul.f32 0.5, %v379_v14  ;;  %v598_v14 = vsub.s32 %v590_v43, %v593_v3  ;;  %vm594_vm2 = vcmp.ge.s32.totalorder %v590_v43, %v593_v3 }
 0x145   :  { %818 = vmatprep.mubr.bf16.mxu1 %v417_v15  ;;  %v378_v24 = vadd.f32 1.0, %v944_v17  ;;  %v393_v4 = vmul.f32 0.5, %v377_v16  ;;  %vm596_vm3 = vcmp.lt.s32.totalorder %v590_v43, %v595_v18  ;;  %v1047_v15 = vmov 1.0  }
 0x146   :  { %v396_v26 = vmul.f32 0.5, %v380_v21  ;;  %v411_v27 = vmul.f32 %v395_v23, %v1226_v42  ;;  %v720_v42 = vld [vmem:[%s1299_s4] ss:$0 sm:$0xff]  ;;  %vm597_vm4 = vmand %vm594_vm2, %vm596_vm3  ;;  %vm602_vm5 = vcmp.lt.s32.totalorder %v598_v14, 8  ;;  %s1048_s4 = smov [#allocation8]  }
 0x147   :  { %v394_v13 = vmul.f32 0.5, %v378_v24  ;;  %v409_v19 = vmul.f32 %v393_v4, %v1230_v48  ;;  %vm603_vm6 = vmand %vm597_vm4, %vm602_vm5  ;;  %s691_s6 = sshll.u32 %s1048_s4, 4  ;;  %s692_s6 = int_to_ptr.vmem [resolvable:$true] %s691_s6 }
 0x148   :  { %v412_v8 = vmul.f32 %v396_v26, %v1236_v56  ;;  %s1011_s7 = scalar_lea.vmem %s692_s6, 128  ;;  %p1016_p11 = scmp.lt.s32.totalorder %s692_s6, %s692_s6 }
 0x149   :  { %v410_v29 = vmul.f32 %v394_v13, %v1242_v62  ;;  %p1012_p10 = scmp.ne.s32.totalorder %s692_s6, %s1011_s7  ;;  %p1017_p12 = scmp.lt.s32.totalorder %s1011_s7, %s1011_s7 }
 0x14a   :  { %819 = vmatmul.mubr.bf16.gmra.mrb[8].mxu1 %v418_v40  ;;  %v420_v30 = vpack.c.bf16 %v412_v8, %v411_v27 }
 0x14b   :  { %v419_v31 = vpack.c.bf16 %v410_v29, %v409_v19  ;;  %p1018_p13 = por %p1017_p12, %p1016_p11 }
 0x14d   :  { %822 = vmatprep.mubr.bf16.mxu1 %v419_v31  ;;  %p1019_p0 = pnand %p1018_p13, %p1012_p10 }
 0x152   :  { %823 = vmatmul.mubr.bf16.gmra.mrb[12].mxu1 %v420_v30 }
 0x20d   :  { %v812_v34 = vpop.f32.mrb[0].mxu1 }
 0x20e   :  { %v526_v56 = vpop.f32.mrb[1].mxu1  ;;  %v535_v35 = vadd.f32 %v812_v34, %v720_v42 }
 0x20f   :  { %v813_v48 = vpop.f32.mrb[2].mxu1  ;;  %v527_v38 = vadd.f32 %v720_v42, %v526_v56 }
 0x210   :  { %v538_v62 = vadd.f32 %v813_v48, %v720_v42  ;;  %v529_v36 = vpop.f32.mrb[3].mxu1 }
 0x211   :  { %v530_v37 = vadd.f32 %v720_v42, %v529_v36 }
 0x212   :  { %v865_v39 = vpack.c.bf16 %v538_v62, %v535_v35 }
 0x213   :  { %v862_v41 = vpack.c.bf16 %v530_v37, %v527_v38 }
 0x215   :  { %v816_v44 = vpop.f32.mrb[4].mxu1  ;;  %863 = vmatpush3.bf16.msra.mxu0 %v862_v41 }
 0x216   :  { %v542_v22 = vpop.f32.mrb[5].mxu1  ;;  %864 = vmatprep.subr.bf16.mxu0 %v1044_v32  ;;  %v551_v46 = vadd.f32 %v816_v44, %v720_v42 }
 0x217   :  { %v817_v45 = vpop.f32.mrb[6].mxu1  ;;  %v543_v50 = vadd.f32 %v720_v42, %v542_v22 }
 0x218   :  { %v554_v47 = vadd.f32 %v817_v45, %v720_v42  ;;  %v545_v28 = vpop.f32.mrb[7].mxu1 }
 0x219   :  { %v546_v20 = vadd.f32 %v720_v42, %v545_v28  ;;  %866 = vmatpush3.bf16.msra.mxu0 %v865_v39 }
 0x21a   :  { %v871_v51 = vpack.c.bf16 %v554_v47, %v551_v46  ;;  %867 = vmatprep.subr.bf16.mxu0 %v1044_v32 }
 0x21b   :  { %v868_v25 = vpack.c.bf16 %v546_v20, %v543_v50 }
 0x21d   :  { %v820_v54 = vpop.f32.mrb[8].mxu1  ;;  %869 = vmatpush3.bf16.msra.mxu0 %v868_v25 }
 0x21e   :  { %v558_v55 = vpop.f32.mrb[9].mxu1  ;;  %870 = vmatprep.subr.bf16.mxu0 %v1044_v32  ;;  %v567_v59 = vadd.f32 %v820_v54, %v720_v42 }
 0x21f   :  { %v821_v57 = vpop.f32.mrb[10].mxu1  ;;  %v559_v63 = vadd.f32 %v720_v42, %v558_v55 }
 0x220   :  { %v570_v60 = vadd.f32 %v821_v57, %v720_v42  ;;  %v561_v61 = vpop.f32.mrb[11].mxu1 }
 0x221   :  { %v562_v0 = vadd.f32 %v720_v42, %v561_v61  ;;  %872 = vmatpush3.bf16.msra.mxu0 %v871_v51 }
 0x222   :  { %v877_v1 = vpack.c.bf16 %v570_v60, %v567_v59  ;;  %873 = vmatprep.subr.bf16.mxu0 %v1044_v32 }
 0x223   :  { %v874_v2 = vpack.c.bf16 %v562_v0, %v559_v63 }
 0x225   :  { %v824_v5 = vpop.f32.mrb[12].mxu1  ;;  %875 = vmatpush3.bf16.msra.mxu0 %v874_v2 }
 0x226   :  { %v574_v6 = vpop.f32.mrb[13].mxu1  ;;  %876 = vmatprep.subr.bf16.mxu0 %v1044_v32  ;;  %v583_v52 = vadd.f32 %v824_v5, %v720_v42 }
 0x227   :  { %v825_v7 = vpop.f32.mrb[14].mxu1  ;;  %v575_v11 = vadd.f32 %v720_v42, %v574_v6 }
 0x228   :  { %v586_v9 = vadd.f32 %v825_v7, %v720_v42  ;;  %v577_v10 = vpop.f32.mrb[15].mxu1 }
 0x229   :  { %v578_v12 = vadd.f32 %v720_v42, %v577_v10  ;;  %878 = vmatpush3.bf16.msra.mxu0 %v877_v1 }
 0x22a   :  { %v883_v40 = vpack.c.bf16 %v586_v9, %v583_v52  ;;  %879 = vmatprep.subr.bf16.mxu0 %v1044_v32 }
 0x22b   :  { %v880_v49 = vpack.c.bf16 %v578_v12, %v575_v11 }
 0x22d   :  { %881 = vmatpush3.bf16.msra.mxu0 %v880_v49 }
 0x22e   :  { %882 = vmatprep.subr.bf16.mxu0 %v1044_v32 }
 0x231   :  { %884 = vmatpush3.bf16.msra.mxu0 %v883_v40 }
 0x234   :  { %859 = vmatmul.mubr.msk.f32.vlgmr.msra.gmra.mrb[16].mxu0 %vm603_vm6, %v1047_v15 }
 0x307   :  { %v673_v16 = vpop.f32.mrb[16].mxu0 }
 0x308   :  { %v860_v17 = vpop.f32.mrb[17].mxu0  ;;  %v683_v21 = vmul.f32 0.125, %v673_v16 }
 0x30a   :  { %684 = vst [vmem:[#allocation8] sm:$0xff] %v683_v21 }
 0x30b   :  { %1022 = shalt.err (!%p1019_p0)
}
 0x30c   :  { %s1023_s10 = scalar_lea.hbm %s1300_s5, 128 }
 0x30d   :  { %p1024_p1 = scmp.ne.s32.totalorder %s1300_s5, %s1023_s10  ;;  %p1027_p2 = scmp.lt.u32.totalorder %s1023_s10, %s1300_s5 }
 0x30f   :  { %p1029_p3 = pnand %p1027_p2, %p1024_p1 }
 0x311   :  { %1032 = shalt.err (!%p1029_p3)
}
 0x312   :  { %694 = dma.vmem_to_hbm [thread:$0]  %s692_s6, 128, %s1300_s5, [#allocation4]  }
 0x313   :  { %1037 = dma.done.wait [#allocation4], 128  }
 0x314   :  { %1038 = vsyncadd [#allocation4], 4294967168 }
 0x315   :  { %698 = vsyncpa [#allocation3], 1 }
 0x316   :  { %699 = vsyncpa [#allocation6], 1 }
 0x317   :  { %700 = vsyncpa [#allocation4], 1 }

</bundles_post_ra>
